<compile_context>
chip_gen: v7x
topology: tpu7x:2x2x1
jax: 0.10.0
libtpu: 0.0.40
codegen_flags: <defaults>
</compile_context>

<pallas_src>
import jax
import jax.numpy as jnp
from jax.experimental import pallas as pl
from jax.experimental.pallas import tpu as pltpu


# ----------------------------- helpers ------------------------------------ #
def _round_up(x, m):
    return (x + m - 1) // m * m


def _choose_pack(d):
    """How many logical output rows to pack per 128-lane kernel row."""
    if d >= 128 or 128 % d != 0:
        return 1
    return 128 // d


def _block_diag(w, pack):
    """block_diag(w, ..., w) with `pack` copies. w: (k, d) -> (pack*k, pack*d)."""
    k, d = w.shape
    wp = jnp.zeros((pack * k, pack * d), w.dtype)
    for j in range(pack):
        wp = wp.at[j * k:(j + 1) * k, j * d:(j + 1) * d].set(w)
    return wp


# ----------------------------- Pallas kernel ------------------------------ #
def _proj_kernel(x_ref, w_ref, b_ref, out_ref):
    # x_ref : (TM, PACK*K_pad) bf16   packed activation rows
    # w_ref : (PACK*K_pad, PACK*D) bf16  block-diagonal projection weight
    # b_ref : (1, PACK*D) f32           tiled bias
    # out   : (TM, PACK*D) f32          lane-dense packed output
    out_ref[...] = (
        jnp.dot(x_ref[...], w_ref[...], preferred_element_type=jnp.float32)
        + b_ref[...]
    )


def project_rows(x_packed, w_packed, bias_packed, *, max_tile_m=1024):
    """Packed rows (M, PACK*K) @ block-diag weight -> (M, PACK*D) f32."""
    m, kp = x_packed.shape
    dp = w_packed.shape[1]

    # One big tile if it fits, otherwise tiles of max_tile_m packed rows.
    m8 = _round_up(m, 8)
    tile_m = m8 if m8 <= max_tile_m else max_tile_m
    m_pad = _round_up(m, tile_m)
    if m_pad != m:
        x_packed = jnp.pad(x_packed, ((0, m_pad - m), (0, 0)))

    grid = (m_pad // tile_m,)
    flops = 2 * m_pad * kp * dp
    bytes_accessed = (m_pad * kp * 2            # bf16 activations
                      + kp * dp * 2             # bf16 weight (resident)
                      + dp * 4                  # bias
                      + m_pad * dp * 4)         # f32 output

    out = pl.pallas_call(
        _proj_kernel,
        out_shape=jax.ShapeDtypeStruct((m_pad, dp), jnp.float32),
        grid_spec=pltpu.PrefetchScalarGridSpec(
            num_scalar_prefetch=0,
            grid=grid,
            in_specs=[
                pl.BlockSpec((tile_m, kp), lambda i: (i, 0)),   # packed activations
                pl.BlockSpec((kp, dp),     lambda i: (0, 0)),   # weight (resident)
                pl.BlockSpec((1, dp),      lambda i: (0, 0)),   # bias   (resident)
            ],
            out_specs=pl.BlockSpec((tile_m, dp), lambda i: (i, 0)),
        ),
        compiler_params=pltpu.CompilerParams(
            dimension_semantics=("parallel",)),
        cost_estimate=pl.CostEstimate(flops=flops, transcendentals=0,
                                      bytes_accessed=bytes_accessed),
    )(x_packed, w_packed, bias_packed)
    return out[:m]


# ------------------------------- Forward ---------------------------------- #
def wordnet_all_embedding_forward(entity_ids, params, *,
                                  include_null_embedding=True,
                                  max_tile_m=1024):
    """entity_ids: (B, C, E) int32 -> (B, C, E, entity_dim) float32."""
    B, C, E = entity_ids.shape
    n = B * C * E
    d = params["w_proj_t"].shape[1]
    k = params["w_proj_t"].shape[0]
    pack = _choose_pack(d)

    flat_ids = entity_ids.reshape(-1)

    # NOTE: torch.unique(return_inverse=True) in the original module is only a
    # compute-dedup trick; projecting the flat gathered rows directly gives the
    # identical result, so the unique/sort/inverse-gather glue is dropped.
    ent = params["entity_embeddings"][flat_ids]                            # (N, E_dim)
    pos = params["pos_embeddings"][params["entity_id_to_pos_index"][flat_ids]]  # (N, P_dim)

    # concat and zero-pad K so that pack*K_pad is a multiple of 128 lanes.
    x = jnp.concatenate([ent, pos], axis=-1)                               # (N, k)
    k_pad = _round_up(k, 128 // pack if pack > 1 else 8)
    if k_pad != k:
        x = jnp.pad(x, ((0, 0), (0, k_pad - k)))

    # Pack `pack` logical rows into one lane-dense kernel row.
    n_pad = _round_up(n, pack)
    if n_pad != n:
        x = jnp.pad(x, ((0, n_pad - n), (0, 0)))
    x_packed = x.reshape(n_pad // pack, pack * k_pad).astype(jnp.bfloat16)

    # Block-diagonal weight / tiled bias (precomputed per-pack layout).
    w_pad = params["w_proj_t"]
    if k_pad != k:
        w_pad = jnp.pad(w_pad, ((0, k_pad - k), (0, 0)))
    w_packed = _block_diag(w_pad, pack).astype(jnp.bfloat16)               # (pack*k_pad, pack*d)
    bias_packed = jnp.tile(params["bias"], pack)[None, :].astype(jnp.float32)

    y_packed = project_rows(x_packed, w_packed, bias_packed,
                            max_tile_m=max_tile_m)                         # (n_pad/pack, pack*d)
    y = y_packed.reshape(n_pad, d)[:n].reshape(B, C, E, d)

    # TODO(synk): training-mode dropout is not implemented (eval identity).

    if include_null_embedding:
        null_mask = (entity_ids == params["null_id"])[..., None]
        y = jnp.where(null_mask, params["null_embedding"], y)
    return y


# ------------------------- deterministic parameters ------------------------ #
def make_params(key, *, vocab_size, entity_emb_dim, pos_emb_dim, entity_dim, null_id):
    k1, k2, k3, k4, k5 = jax.random.split(key, 5)

    entity_embeddings = 0.02 * jax.random.normal(k1, (vocab_size, entity_emb_dim),
                                                 jnp.float32)
    entity_embeddings = entity_embeddings.at[0].set(0.0)           # padding_idx=0

    pos_embeddings = 0.02 * jax.random.normal(k2, (vocab_size, pos_emb_dim),
                                              jnp.float32)

    # entity_id_to_pos_index buffer: POS index (0..8) per vocab entry.
    entity_id_to_pos_index = jax.random.randint(k3, (vocab_size,), 0, 9, jnp.int32)

    # Linear(concat_dim, entity_dim): torch weight is (out, in); store transposed.
    concat_dim = entity_emb_dim + pos_emb_dim
    w = 0.02 * jax.random.normal(k4, (entity_dim, concat_dim), jnp.float32)
    w_proj_t = w.T                                                 # (concat_dim, D)
    bias = jnp.zeros((entity_dim,), jnp.float32)                   # init_bert_weights: bias=0

    null_embedding = 0.02 * jax.random.normal(k5, (entity_dim,), jnp.float32)

    return {
        "entity_embeddings": entity_embeddings,
        "pos_embeddings": pos_embeddings,
        "entity_id_to_pos_index": entity_id_to_pos_index,
        "w_proj_t": w_proj_t,
        "bias": bias,
        "null_embedding": null_embedding,
        "null_id": jnp.int32(null_id),
    }


def _reference_forward(entity_ids, params, include_null_embedding=True):
    """Plain-JAX f32 reference mirroring the PyTorch forward (eval mode)."""
    ent = params["entity_embeddings"][entity_ids]                  # (B,C,E,E_dim)
    pos = params["pos_embeddings"][params["entity_id_to_pos_index"][entity_ids]]
    x = jnp.concatenate([ent, pos], axis=-1)
    y = x @ params["w_proj_t"] + params["bias"]
    if include_null_embedding:
        mask = (entity_ids == params["null_id"])[..., None]
        y = jnp.where(mask, params["null_embedding"], y)
    return y


# --------------------------------- main ------------------------------------ #
if __name__ == "__main__":
    key = jax.random.PRNGKey(0)
    k_ids, k_params = jax.random.split(key)

    # Small shapes consistent with the module's forward contract.
    B, C, E = 2, 4, 8            # (batch, num_candidates, num_entities)
    vocab_size = 50
    entity_emb_dim = 32          # pretrained entity embedding dim
    pos_emb_dim = 25             # module default
    entity_dim = 32              # projection output dim
    null_id = 7                  # synthetic '@@NULL@@' vocab index

    params = make_params(k_params,
                         vocab_size=vocab_size,
                         entity_emb_dim=entity_emb_dim,
                         pos_emb_dim=pos_emb_dim,
                         entity_dim=entity_dim,
                         null_id=null_id)

    entity_ids = jax.random.randint(k_ids, (B, C, E), 0, vocab_size, jnp.int32)
    # Make sure padding (0) and null ids appear at least once.
    entity_ids = entity_ids.at[0, 0, 0].set(0).at[0, 0, 1].set(null_id)

    out = wordnet_all_embedding_forward(entity_ids, params,
                                        include_null_embedding=True)
    out = jax.block_until_ready(out)

    assert out.shape == (B, C, E, entity_dim), out.shape

    ref = _reference_forward(entity_ids, params, include_null_embedding=True)
    # Kernel uses bf16 activations/weights with f32 accumulate; values ~3e-3,
    # expected rounding error ~1e-5, so these tolerances still catch real bugs.
    assert jnp.allclose(out, ref, atol=3e-4, rtol=3e-3), (
        float(jnp.max(jnp.abs(out - ref))))

    print("KERNEL_OK")
</pallas_src>

<mosaic_0001>
module attributes {stable_mosaic.version = 11 : i64} {
  func.func @_proj_kernel(%arg0: i32, %arg1: memref<16x256xbf16, #tpu.memory_space<vmem>>, %arg2: memref<256x128xbf16, #tpu.memory_space<vmem>>, %arg3: memref<1x128xf32, #tpu.memory_space<vmem>>, %arg4: memref<16x128xf32, #tpu.memory_space<vmem>>) attributes {dimension_semantics = [#tpu.dimension_semantics<parallel>], iteration_bounds = array<i64: 1>, scalar_prefetch = 0 : i64, scratch_operands = 0 : i64, tpu.core_type = #tpu.core_type<tc>, window_params = [{transform_indices = @transform_0, window_bounds = array<i64: 16, 256>}, {pipeline_mode = #tpu.pipeline_mode<synchronous>, transform_indices = @transform_1, window_bounds = array<i64: 256, 128>}, {pipeline_mode = #tpu.pipeline_mode<synchronous>, transform_indices = @transform_2, window_bounds = array<i64: 1, 128>}, {transform_indices = @transform_3, window_bounds = array<i64: 16, 128>}]} {
    %c0 = arith.constant 0 : index
    %c0_0 = arith.constant 0 : index
    %0 = vector.load %arg1[%c0, %c0_0] : memref<16x256xbf16, #tpu.memory_space<vmem>>, vector<16x256xbf16>
    %c0_1 = arith.constant 0 : index
    %c0_2 = arith.constant 0 : index
    %1 = vector.load %arg2[%c0_1, %c0_2] : memref<256x128xbf16, #tpu.memory_space<vmem>>, vector<256x128xbf16>
    %cst = arith.constant dense<0.000000e+00> : vector<16x128xf32>
    %2 = tpu.matmul %0, %1, %cst {dimension_numbers = #tpu.dot_dimension_numbers<[1], [0], [0], [1], [0, 0, 1, 1], [], []>} : vector<16x256xbf16>, vector<256x128xbf16>, vector<16x128xf32> -> vector<16x128xf32>
    %c0_3 = arith.constant 0 : index
    %c0_4 = arith.constant 0 : index
    %3 = vector.load %arg3[%c0_3, %c0_4] : memref<1x128xf32, #tpu.memory_space<vmem>>, vector<1x128xf32>
    %4 = vector.broadcast %3 : vector<1x128xf32> to vector<16x128xf32>
    %5 = arith.addf %2, %4 : vector<16x128xf32>
    %c0_5 = arith.constant 0 : index
    %c0_6 = arith.constant 0 : index
    %6 = vector.load %arg4[%c0_5, %c0_6] : memref<16x128xf32, #tpu.memory_space<vmem>>, vector<16x128xf32>
    tpu.vector_store %arg4[%c0_5, %c0_6], %5 {strides = array<i32>} : memref<16x128xf32, #tpu.memory_space<vmem>>, vector<16x128xf32>,
    return
  }
  func.func @transform_0(%arg0: i32) -> (i32, i32) {
    %c0_i32 = arith.constant 0 : i32
    %c0_i32_0 = arith.constant 0 : i32
    return %arg0, %c0_i32 : i32, i32
  }
  func.func @transform_1(%arg0: i32) -> (i32, i32) {
    %c0_i32 = arith.constant 0 : i32
    %c0_i32_0 = arith.constant 0 : i32
    %c0_i32_1 = arith.constant 0 : i32
    return %c0_i32, %c0_i32_0 : i32, i32
  }
  func.func @transform_2(%arg0: i32) -> (i32, i32) {
    %c0_i32 = arith.constant 0 : i32
    %c0_i32_0 = arith.constant 0 : i32
    %c0_i32_1 = arith.constant 0 : i32
    return %c0_i32, %c0_i32_0 : i32, i32
  }
  func.func @transform_3(%arg0: i32) -> (i32, i32) {
    %c0_i32 = arith.constant 0 : i32
    %c0_i32_0 = arith.constant 0 : i32
    return %arg0, %c0_i32 : i32, i32
  }
}

</mosaic_0001>

<bundles_post_ra>
// kernel: tpu_custom_call.1
= control target key start
LH: loop header
LB: loop body
LE: loop exit
PB: predicated region body
PF: predicated region fallthrough
CT: control target
= control target key end

     0   :  { %8 = vsyncpa [#allocation3], 0  ;;  %s463_s0 = inlined_call_operand.hbm [shape: bf16[16,256], index: 0, kind: input, shape index: {}]   ;;  %s464_s1 = inlined_call_operand.hbm [shape: bf16[256,128], index: 1, kind: input, shape index: {}]   ;;  %s465_s2 = inlined_call_operand.vmem [shape: f32[1,128], index: 2, kind: input, shape index: {}]   ;;  %s466_s3 = inlined_call_operand.hbm [shape: f32[16,128], index: 3, kind: output, shape index: {}]  }
   0x1   :  { %9 = vsyncpa [#allocation6], 0 }
   0x2   :  { %10 = vsyncpa [#allocation4], 0  ;;  %s391_s12 = smov [#allocation2]   ;;  %s319_s16 = scalar_lea.hbm %s463_s0, 256 }
   0x3   :  { %s16_s13 = sshll.u32 %s391_s12, 4  ;;  %p320_p0 = scmp.ne.s32.totalorder %s463_s0, %s319_s16  ;;  %s17_s13 = int_to_ptr.vmem [resolvable:$true] %s16_s13 }
   0x4   :  { %p323_p1 = scmp.lt.u32.totalorder %s319_s16, %s463_s0 }
   0x6   :  { %p325_p2 = pnand %p323_p1, %p320_p0 }
   0x8   :  { %328 = shalt.err (!%p325_p2)
}
   0x9   :  { %s329_s21 = scalar_lea.vmem %s17_s13, 256  ;;  %p334_p4 = scmp.lt.s32.totalorder %s17_s13, %s17_s13 }
   0xa   :  { %p330_p3 = scmp.ne.s32.totalorder %s17_s13, %s329_s21  ;;  %p335_p5 = scmp.lt.s32.totalorder %s329_s21, %s329_s21 }
   0xc   :  { %p336_p6 = por %p335_p5, %p334_p4 }
   0xe   :  { %p337_p7 = pnand %p336_p6, %p330_p3 }
  0x10   :  { %340 = shalt.err (!%p337_p7)
}
  0x11   :  { %s392_s22 = smov 128   ;;  %s393_s23 = smov 8  }
  0x12   :  { %22 = dma.hbm_to_vmem [thread:$0]  %s463_s0, 256, %s17_s13, [#allocation3], %s392_s22, %s392_s22, %s393_s23  }
  0x13   :  { %s394_s26 = smov [#allocation5]   ;;  %s341_s30 = scalar_lea.hbm %s464_s1, 2048 }
  0x14   :  { %s28_s27 = sshll.u32 %s394_s26, 4  ;;  %p342_p8 = scmp.ne.s32.totalorder %s464_s1, %s341_s30  ;;  %s29_s27 = int_to_ptr.vmem [resolvable:$true] %s28_s27 }
  0x15   :  { %p345_p9 = scmp.lt.u32.totalorder %s341_s30, %s464_s1 }
  0x17   :  { %p347_p10 = pnand %p345_p9, %p342_p8 }
  0x19   :  { %350 = shalt.err (!%p347_p10)
}
  0x1a   :  { %s351_s8 = scalar_lea.vmem %s29_s27, 2048  ;;  %p356_p12 = scmp.lt.s32.totalorder %s29_s27, %s29_s27 }
  0x1b   :  { %p352_p11 = scmp.ne.s32.totalorder %s29_s27, %s351_s8  ;;  %p357_p13 = scmp.lt.s32.totalorder %s351_s8, %s351_s8 }
  0x1d   :  { %p358_p0 = por %p357_p13, %p356_p12 }
  0x1f   :  { %p359_p1 = pnand %p358_p0, %p352_p11 }
  0x21   :  { %362 = shalt.err (!%p359_p1)
}
  0x22   :  { %s395_s0 = smov 64   ;;  %s396_s9 = smov 4  }
  0x23   :  { %34 = dma.hbm_to_vmem [thread:$0]  %s464_s1, 2048, %s29_s27, [#allocation6], %s395_s0, %s395_s0, %s396_s9  }
  0x24   :  { %385 = dma.done.wait [#allocation3], 256  }
  0x25   :  { %386 = vsyncadd [#allocation3], 4294967040 }
  0x26   :  { %387 = dma.done.wait [#allocation6], 2048  }
  0x27   :  { %388 = vsyncadd [#allocation6], 4294965248  ;;  %v300_v0 = vld [vmem:[#allocation5 + $0x40] sm:$0xff]   ;;  %v302_v2 = vld [vmem:[#allocation5 + $0x48] sm:$0xff]   ;;  %s397_s13 = smov [#allocation7]  }
  0x28   :  { %v301_v1 = vld [vmem:[#allocation5] sm:$0xff]   ;;  %271 = vmatprep.subr.bf16.mxu0 %v300_v0  ;;  %v303_v3 = vld [vmem:[#allocation5 + $0x8] sm:$0xff]   ;;  %v304_v4 = vld [vmem:[#allocation5 + $0x50] sm:$0xff]   ;;  %s239_s14 = sshll.u32 %s397_s13, 4  ;;  %s240_s14 = int_to_ptr.vmem [resolvable:$true] %s239_s14 }
  0x29   :  { %272 = vmatpush3.bf16.msra.mxu0 %v301_v1  ;;  %v305_v5 = vld [vmem:[#allocation5 + $0x10] sm:$0xff]   ;;  %v306_v6 = vld [vmem:[#allocation5 + $0x58] sm:$0xff]   ;;  %v308_v8 = vld [vmem:[#allocation5 + $0x60] sm:$0xff]   ;;  %s363_s15 = scalar_lea.vmem %s240_s14, 256  ;;  %p368_p3 = scmp.lt.s32.totalorder %s240_s14, %s240_s14 }
  0x2a   :  { %273 = vmatprep.subr.bf16.mxu0 %v302_v2  ;;  %v307_v7 = vld [vmem:[#allocation5 + $0x18] sm:$0xff]   ;;  %v309_v9 = vld [vmem:[#allocation5 + $0x20] sm:$0xff]   ;;  %v310_v10 = vld [vmem:[#allocation5 + $0x68] sm:$0xff]   ;;  %p364_p2 = scmp.ne.s32.totalorder %s240_s14, %s363_s15  ;;  %p369_p4 = scmp.lt.s32.totalorder %s363_s15, %s363_s15 }
  0x2b   :  { %v318_v11 = vld [vmem:[#allocation2 + $0x4] ss:$8 sps:$4 sm:$0xff]   ;;  %v311_v12 = vld [vmem:[#allocation5 + $0x28] sm:$0xff]   ;;  %v316_v17 = vld [vmem:[#allocation2] ss:$8 sps:$4 sm:$0xff]  }
  0x2c   :  { %223 = vmatprep.mubr.bf16.mxu0 %v318_v11  ;;  %v312_v13 = vld [vmem:[#allocation5 + $0x70] sm:$0xff]   ;;  %v314_v15 = vld [vmem:[#allocation5 + $0x78] sm:$0xff]   ;;  %p370_p5 = por %p369_p4, %p368_p3 }
  0x2d   :  { %274 = vmatpush3.bf16.msra.mxu0 %v303_v3  ;;  %v313_v14 = vld [vmem:[#allocation5 + $0x30] sm:$0xff]   ;;  %v315_v16 = vld [vmem:[#allocation5 + $0x38] sm:$0xff]  }
  0x2e   :  { %275 = vmatprep.subr.bf16.mxu0 %v304_v4  ;;  %v252_v19 = vld [vmem:[%s465_s2] ss:$0 sm:$0xff]  ;;  %p371_p6 = pnand %p370_p5, %p364_p2 }
  0x31   :  { %276 = vmatpush3.bf16.msra.mxu0 %v305_v5 }
  0x32   :  { %277 = vmatprep.subr.bf16.mxu0 %v306_v6 }
  0x35   :  { %278 = vmatpush3.bf16.msra.mxu0 %v307_v7 }
  0x36   :  { %279 = vmatprep.subr.bf16.mxu0 %v308_v8 }
  0x39   :  { %280 = vmatpush3.bf16.msra.mxu0 %v309_v9 }
  0x3a   :  { %281 = vmatprep.subr.bf16.mxu0 %v310_v10 }
  0x3d   :  { %282 = vmatpush3.bf16.msra.mxu0 %v311_v12 }
  0x3e   :  { %283 = vmatprep.subr.bf16.mxu0 %v312_v13 }
  0x41   :  { %284 = vmatpush3.bf16.msra.mxu0 %v313_v14 }
  0x42   :  { %285 = vmatprep.subr.bf16.mxu0 %v314_v15 }
  0x45   :  { %286 = vmatpush3.bf16.msra.mxu0 %v315_v16 }
  0x48   :  { %224 = vmatmul.mubr.bf16.vlgmr.msra.gmra.mrb[0].mxu0 %v316_v17 }
 0x11b   :  { %v287_v18 = vpop.f32.mrb[0].mxu0 }
 0x11c   :  { %v288_v20 = vpop.f32.mrb[1].mxu0 }
 0x11d   :  { %v289_v21 = vadd.f32 %v288_v20, %v287_v18  ;;  %v290_v22 = vpop.f32.mrb[2].mxu0 }
 0x11e   :  { %v291_v23 = vpop.f32.mrb[3].mxu0 }
 0x11f   :  { %v226_v24 = vadd.f32 %v289_v21, %v252_v19  ;;  %v292_v25 = vadd.f32 %v291_v23, %v290_v22 }
 0x121   :  { %232 = vst [vmem:[#allocation7] sm:$0xff] %v226_v24  ;;  %v229_v26 = vadd.f32 %v292_v25, %v252_v19 }
 0x123   :  { %233 = vst [vmem:[#allocation7 + $0x8] sm:$0xff] %v229_v26 }
 0x124   :  { %374 = shalt.err (!%p371_p6)
}
 0x125   :  { %s375_s17 = scalar_lea.hbm %s466_s3, 256 }
 0x126   :  { %p376_p7 = scmp.ne.s32.totalorder %s466_s3, %s375_s17  ;;  %p379_p8 = scmp.lt.u32.totalorder %s375_s17, %s466_s3 }
 0x128   :  { %p381_p9 = pnand %p379_p8, %p376_p7 }
 0x12a   :  { %384 = shalt.err (!%p381_p9)
}
 0x12b   :  { %245 = dma.vmem_to_hbm [thread:$0]  %s240_s14, 256, %s466_s3, [#allocation4], %s392_s22, %s392_s22, %s393_s23  }
 0x12c   :  { %389 = dma.done.wait [#allocation4], 256  }
 0x12d   :  { %390 = vsyncadd [#allocation4], 4294967040 }
 0x12e   :  { %249 = vsyncpa [#allocation3], 1 }
 0x12f   :  { %250 = vsyncpa [#allocation6], 1 }
 0x130   :  { %251 = vsyncpa [#allocation4], 1 }

</bundles_post_ra>
